<compile_context>
chip_gen: v6e
topology: v6e:2x2x1
jax: 0.10.0
libtpu: 0.0.40
codegen_flags: <defaults>
</compile_context>

<pallas_src>
import jax
import jax.numpy as jnp
from jax import lax
from jax.experimental import pallas as pl
from jax.experimental.pallas import tpu as pltpu


def _disc_kernel(v_ref, hpl_ref, hmi_ref, out_ref):
    # v_ref: (1, D)   hpl_ref/hmi_ref: (TM, D)   out_ref: (2, TM)
    v = v_ref[...]
    dn = (((1,), (1,)), ((), ()))  # contract D of v against D of h -> (1, TM)
    out_ref[0:1, :] = lax.dot_general(
        v, hpl_ref[...], dn, preferred_element_type=jnp.float32)
    out_ref[1:2, :] = lax.dot_general(
        v, hmi_ref[...], dn, preferred_element_type=jnp.float32)


_TARGET_TILE_BYTES = 8 << 20   # per h-input tile; keeps the ~0.35us/step
                               # overhead <10% of step DMA even at v7x HBM BW


def _tpu_vmem_limit_bytes():
    """Explicit scoped-VMEM limit: ~3/4 of physical capacity, capped at 64 MiB
    (v5e/v6e have 128 MiB physical per core, v7x 64 MiB)."""
    try:
        cap = int(pltpu.get_tpu_info().vmem_capacity_bytes)
    except Exception:
        cap = 64 << 20          # conservative fallback (v7x per-core VMEM)
    return int(min(64 << 20, (cap * 3) // 4))


def _pick_tile_rows(n, d, itemsize, vmem_limit):
    """Row-tile size from a per-tile byte target, capped by the VMEM limit.

    Per grid step the pipelined VMEM footprint is
        2 h inputs x 2 buffers x (tm * d * itemsize)        input tiles
      + 2 buffers   x (8 * tm * 4)                          (2,tm) f32 output
                                                            (sublanes pad 2->8)
    Keep that under ~2/3 of the vmem limit, otherwise aim for
    _TARGET_TILE_BYTES per h tile (no fixed row ceiling).
    """
    bytes_per_row = 4 * d * itemsize + 2 * 8 * 4
    tm_cap = ((vmem_limit * 2) // 3) // bytes_per_row
    tm = min(_TARGET_TILE_BYTES // (d * itemsize), tm_cap)
    tm = max(128, (tm // 128) * 128)
    if n > tm:
        return tm
    # Whole array fits in a single tile.  Still split large-N cases into two
    # 128-aligned tiles so the "parallel" row axis can shard across v7x's two
    # TensorCores; the extra ~0.35us step is noise on 1-TC chips at this size.
    if n >= 2048:
        return ((pl.cdiv(n, 2) + 127) // 128) * 128
    return n                     # single block == full array dims (legal)


def discriminator_forward(c, h_pl, h_mi, W0, bias, s_bias1=None, s_bias2=None):
    """Exact forward of Discriminator.forward.

    c:    (n_h,)      summary vector
    h_pl: (N, n_h)    positive node embeddings
    h_mi: (N, n_h)    negative (corrupted) node embeddings
    W0:   (n_h, n_h)  bilinear weight (output index squeezed)
    bias: ()          bilinear bias
    returns logits: (2N,)
    """
    N, D = h_pl.shape
    assert h_mi.shape == (N, D)

    # One common streaming dtype for both h inputs (guards mixed-dtype calls).
    h_dtype = jnp.promote_types(h_pl.dtype, h_mi.dtype)
    h_pl = h_pl.astype(h_dtype)
    h_mi = h_mi.astype(h_dtype)
    itemsize = jnp.dtype(h_dtype).itemsize

    # Tiny (D, D) matvec hoisted out of the kernel; cast to the streaming
    # dtype so the in-kernel dot runs natively (f32 accumulation in-kernel).
    v = (W0.astype(jnp.float32) @ c.astype(jnp.float32)).reshape(1, D)
    v = v.astype(h_dtype)

    vmem_limit = _tpu_vmem_limit_bytes()
    tm = _pick_tile_rows(N, D, itemsize, vmem_limit)
    grid = (pl.cdiv(N, tm),)

    cost = pl.CostEstimate(
        flops=4 * N * D,                                   # two (N,D)@(D,) matvecs
        bytes_accessed=2 * N * D * itemsize + D * itemsize + 2 * N * 4,
        transcendentals=0,
    )

    out = pl.pallas_call(
        _disc_kernel,
        out_shape=jax.ShapeDtypeStruct((2, N), jnp.float32),
        grid=grid,
        in_specs=[
            pl.BlockSpec((1, D), lambda i: (0, 0)),    # v, resident
            pl.BlockSpec((tm, D), lambda i: (i, 0)),   # h_pl row tile
            pl.BlockSpec((tm, D), lambda i: (i, 0)),   # h_mi row tile
        ],
        out_specs=pl.BlockSpec((2, tm), lambda i: (0, i)),  # lane-dense
        compiler_params=pltpu.CompilerParams(
            dimension_semantics=("parallel",),
            vmem_limit_bytes=vmem_limit),
        cost_estimate=cost,
    )(v, h_pl, h_mi)

    # (2, N) row-major reshape -> [sc_1 ..., sc_2 ...]; fold scalar bias here.
    logits = out.reshape(2 * N) + jnp.asarray(bias, jnp.float32)
    if s_bias1 is not None or s_bias2 is not None:
        sc1, sc2 = logits[:N], logits[N:]
        if s_bias1 is not None:
            sc1 = sc1 + s_bias1
        if s_bias2 is not None:
            sc2 = sc2 + s_bias2
        logits = jnp.concatenate([sc1, sc2], axis=0)
    return logits


def _reference_forward(c, h_pl, h_mi, W0, bias):
    v = W0 @ c
    sc_1 = h_pl @ v + bias
    sc_2 = h_mi @ v + bias
    return jnp.concatenate([sc_1, sc_2], axis=0)


if __name__ == "__main__":
    def make_inputs(key, n, n_h):
        k_c, k_pl, k_mi, k_w = jax.random.split(key, 4)
        c = jax.random.normal(k_c, (n_h,), jnp.float32)
        h_pl = jax.random.normal(k_pl, (n, n_h), jnp.float32)
        h_mi = jax.random.normal(k_mi, (n, n_h), jnp.float32)
        # xavier_uniform init of nn.Bilinear weight (1, n_h, n_h):
        # fan_in = n_h*n_h, fan_out = 1*n_h -> bound = sqrt(6/(fan_in+fan_out))
        bound = (6.0 / (n_h * n_h + n_h)) ** 0.5
        W0 = jax.random.uniform(k_w, (n_h, n_h), jnp.float32,
                                minval=-bound, maxval=bound)
        bias = jnp.float32(0.0)   # bias.data.fill_(0.0)
        return c, h_pl, h_mi, W0, bias

    key = jax.random.PRNGKey(0)
    k_small, k_big = jax.random.split(key)

    # Small case (single-block path), matching the module's toy sizes.
    n_h, N = 32, 8
    c, h_pl, h_mi, W0, bias = make_inputs(k_small, N, n_h)
    logits = discriminator_forward(c, h_pl, h_mi, W0, bias)
    jax.block_until_ready(logits)
    ref = _reference_forward(c, h_pl, h_mi, W0, bias)
    assert logits.shape == (2 * N,)
    assert jnp.allclose(logits, ref, atol=1e-4, rtol=1e-4)

    # Larger case exercising the tiled / megacore-splittable path (grid of 2).
    n_h2, N2 = 64, 4096
    c2, h_pl2, h_mi2, W02, bias2 = make_inputs(k_big, N2, n_h2)
    logits2 = discriminator_forward(c2, h_pl2, h_mi2, W02, bias2)
    jax.block_until_ready(logits2)
    ref2 = _reference_forward(c2, h_pl2, h_mi2, W02, bias2)
    assert logits2.shape == (2 * N2,)
    assert jnp.allclose(logits2, ref2, atol=1e-3, rtol=1e-3)

    print("KERNEL_OK")
</pallas_src>

<mosaic_0001>
module attributes {stable_mosaic.version = 11 : i64} {
  func.func @_disc_kernel(%arg0: i32, %arg1: memref<1x32xf32, #tpu.memory_space<vmem>>, %arg2: memref<8x32xf32, #tpu.memory_space<vmem>>, %arg3: memref<8x32xf32, #tpu.memory_space<vmem>>, %arg4: memref<2x8xf32, #tpu.memory_space<vmem>>) attributes {dimension_semantics = [#tpu.dimension_semantics<parallel>], iteration_bounds = array<i64: 1>, scalar_prefetch = 0 : i64, scratch_operands = 0 : i64, tpu.core_type = #tpu.core_type<tc>, window_params = [{pipeline_mode = #tpu.pipeline_mode<synchronous>, transform_indices = @transform_0, window_bounds = array<i64: 1, 32>}, {transform_indices = @transform_1, window_bounds = array<i64: 8, 32>}, {transform_indices = @transform_2, window_bounds = array<i64: 8, 32>}, {transform_indices = @transform_3, window_bounds = array<i64: 2, 8>}]} {
    %c0 = arith.constant 0 : index
    %c0_0 = arith.constant 0 : index
    %0 = vector.load %arg1[%c0, %c0_0] : memref<1x32xf32, #tpu.memory_space<vmem>>, vector<1x32xf32>
    %c0_1 = arith.constant 0 : index
    %c0_2 = arith.constant 0 : index
    %1 = vector.load %arg2[%c0_1, %c0_2] : memref<8x32xf32, #tpu.memory_space<vmem>>, vector<8x32xf32>
    %cst = arith.constant dense<0.000000e+00> : vector<1x8xf32>
    %2 = tpu.matmul %0, %1, %cst {dimension_numbers = #tpu.dot_dimension_numbers<[1], [1], [0], [0], [0, 0, 1, 0], [], []>} : vector<1x32xf32>, vector<8x32xf32>, vector<1x8xf32> -> vector<1x8xf32>
    %c0_3 = arith.constant 0 : index
    %c0_4 = arith.constant 0 : index
    %3 = vector.load %arg4[%c0_3, %c0_4] : memref<2x8xf32, #tpu.memory_space<vmem>>, vector<1x8xf32>
    tpu.vector_store %arg4[%c0_3, %c0_4], %2 {strides = array<i32>} : memref<2x8xf32, #tpu.memory_space<vmem>>, vector<1x8xf32>,
    %c0_5 = arith.constant 0 : index
    %c0_6 = arith.constant 0 : index
    %4 = vector.load %arg3[%c0_5, %c0_6] : memref<8x32xf32, #tpu.memory_space<vmem>>, vector<8x32xf32>
    %cst_7 = arith.constant dense<0.000000e+00> : vector<1x8xf32>
    %5 = tpu.matmul %0, %4, %cst_7 {dimension_numbers = #tpu.dot_dimension_numbers<[1], [1], [0], [0], [0, 0, 1, 0], [], []>} : vector<1x32xf32>, vector<8x32xf32>, vector<1x8xf32> -> vector<1x8xf32>
    %c1 = arith.constant 1 : index
    %c0_8 = arith.constant 0 : index
    %6 = vector.load %arg4[%c1, %c0_8] : memref<2x8xf32, #tpu.memory_space<vmem>>, vector<1x8xf32>
    tpu.vector_store %arg4[%c1, %c0_8], %5 {strides = array<i32>} : memref<2x8xf32, #tpu.memory_space<vmem>>, vector<1x8xf32>,
    return
  }
  func.func @transform_0(%arg0: i32) -> (i32, i32) {
    %c0_i32 = arith.constant 0 : i32
    %c0_i32_0 = arith.constant 0 : i32
    %c0_i32_1 = arith.constant 0 : i32
    return %c0_i32, %c0_i32_0 : i32, i32
  }
  func.func @transform_1(%arg0: i32) -> (i32, i32) {
    %c0_i32 = arith.constant 0 : i32
    %c0_i32_0 = arith.constant 0 : i32
    return %arg0, %c0_i32 : i32, i32
  }
  func.func @transform_2(%arg0: i32) -> (i32, i32) {
    %c0_i32 = arith.constant 0 : i32
    %c0_i32_0 = arith.constant 0 : i32
    return %arg0, %c0_i32 : i32, i32
  }
  func.func @transform_3(%arg0: i32) -> (i32, i32) {
    %c0_i32 = arith.constant 0 : i32
    %c0_i32_0 = arith.constant 0 : i32
    return %c0_i32, %arg0 : i32, i32
  }
}

</mosaic_0001>

<bundles_post_ra>
// kernel: tpu_custom_call.1
= control target key start
LH: loop header
LB: loop body
LE: loop exit
PB: predicated region body
PF: predicated region fallthrough
CT: control target
= control target key end

     0   :  { %8 = vsyncpa [#allocation3], 0  ;;  %s370_s0 = inlined_call_operand.hbm [shape: f32[1,32], index: 0, kind: input, shape index: {}]   ;;  %s371_s1 = inlined_call_operand.hbm [shape: f32[8,32], index: 1, kind: input, shape index: {}]   ;;  %s372_s2 = inlined_call_operand.hbm [shape: f32[8,32], index: 2, kind: input, shape index: {}]   ;;  %s373_s3 = inlined_call_operand.hbm [shape: f32[2,8], index: 3, kind: output, shape index: {}]  }
   0x1   :  { %9 = vsyncpa [#allocation6], 0 }
   0x2   :  { %10 = vsyncpa [#allocation4], 0  ;;  %s332_s12 = smov [#allocation5]   ;;  %s333_s14 = smov [#allocation2]  }
   0x3   :  { %s27_s13 = sshll.u32 %s332_s12, 4  ;;  %s17_s15 = sshll.u32 %s333_s14, 4  ;;  %s28_s13 = int_to_ptr.vmem [resolvable:$true] %s27_s13  ;;  %s18_s15 = int_to_ptr.vmem [resolvable:$true] %s17_s15 }
   0x4   :  { %s254_s16 = scalar_lea.vmem %s28_s13, 128  ;;  %p259_p1 = scmp.lt.s32.totalorder %s28_s13, %s28_s13 }
   0x5   :  { %p255_p0 = scmp.ne.s32.totalorder %s28_s13, %s254_s16  ;;  %p260_p2 = scmp.lt.s32.totalorder %s254_s16, %s254_s16 }
   0x7   :  { %p261_p3 = por %p260_p2, %p259_p1 }
   0x9   :  { %p262_p4 = pnand %p261_p3, %p255_p0 }
   0xb   :  { %265 = shalt.err (!%p262_p4)
}
   0xc   :  { %30 = dma.hbm_to_vmem [thread:$0]  %s371_s1, 128, %s28_s13, [#allocation6]  }
   0xd   :  { %s274_s19 = scalar_lea.vmem %s18_s15, 16  ;;  %s278_s20 = scalar_lea.vmem %s18_s15, 32 }
   0xe   :  { %p275_p5 = scmp.ne.s32.totalorder %s18_s15, %s274_s19  ;;  %p279_p6 = scmp.lt.s32.totalorder %s18_s15, %s18_s15 }
   0xf   :  { %p280_p7 = scmp.lt.s32.totalorder %s278_s20, %s274_s19 }
  0x11   :  { %p281_p8 = por %p280_p7, %p279_p6 }
  0x13   :  { %p282_p9 = pnand %p281_p8, %p275_p5 }
  0x15   :  { %285 = shalt.err (!%p282_p9)
}
  0x16   :  { %20 = dma.hbm_to_vmem [thread:$0]  %s370_s0, 16, %s18_s15, [#allocation3]  }
  0x17   :  { %s334_s23 = smov [#allocation7]  }
  0x18   :  { %s37_s24 = sshll.u32 %s334_s23, 4  ;;  %s38_s24 = int_to_ptr.vmem [resolvable:$true] %s37_s24 }
  0x19   :  { %s294_s25 = scalar_lea.vmem %s38_s24, 128  ;;  %p299_p11 = scmp.lt.s32.totalorder %s38_s24, %s38_s24 }
  0x1a   :  { %p295_p10 = scmp.ne.s32.totalorder %s38_s24, %s294_s25  ;;  %p300_p12 = scmp.lt.s32.totalorder %s294_s25, %s294_s25 }
  0x1c   :  { %p301_p13 = por %p300_p12, %p299_p11 }
  0x1e   :  { %p302_p0 = pnand %p301_p13, %p295_p10 }
  0x20   :  { %305 = shalt.err (!%p302_p0)
}
  0x21   :  { %40 = dma.hbm_to_vmem [thread:$0]  %s372_s2, 128, %s38_s24, [#allocation6]  }
  0x22   :  { %326 = dma.done.wait [#allocation3], 16  }
  0x23   :  { %327 = vsyncadd [#allocation3], 4294967280 }
  0x24   :  { %328 = dma.done.wait [#allocation6], 256  }
  0x25   :  { %329 = vsyncadd [#allocation6], 4294967040  ;;  %v335_v0 = vmov 0.0   ;;  %vm336_vm0 = vmmov 0   ;;  %vm52_vm1 = vcmask 261120   ;;  %v51_v1 = vld [vmem:[#allocation5] sm:$0xff] }
  0x26   :  { %230 = vmatprep.subr.mxu0 %v335_v0  ;;  %235 = vmatprep.subr.mxu1 %v335_v0  ;;  %v131_v2 = vld [vmem:[#allocation7] sm:$0xff]  ;;  %v50_v3 = vld [vmem:[#allocation2] sm:$0x1]  ;;  %s337_s0 = smov [#allocation8]   ;;  %vm129_vm2 = vcmask 57344  }
  0x27   :  { %232 = vmatprep.mubr.msk.f32.mxu0 %vm336_vm0, %v335_v0  ;;  %237 = vmatprep.mubr.msk.f32.mxu1 %vm336_vm0, %v335_v0  ;;  %s212_s2 = sshll.u32 %s337_s0, 4  ;;  %s213_s2 = int_to_ptr.vmem [resolvable:$true] %s212_s2 }
  0x28   :  { %231 = vmatpush3.xpose.msk.msra.mxu0 %vm52_vm1, %v51_v1  ;;  %236 = vmatpush3.xpose.msk.msra.mxu1 %vm52_vm1, %v131_v2  ;;  %s306_s27 = scalar_lea.vmem %s213_s2, 32  ;;  %p311_p2 = scmp.lt.s32.totalorder %s213_s2, %s213_s2 }
  0x29   :  { %p307_p1 = scmp.ne.s32.totalorder %s213_s2, %s306_s27  ;;  %p312_p3 = scmp.lt.s32.totalorder %s306_s27, %s306_s27 }
  0x2b   :  { %233 = vmatmul.mubr.msk.f32.vlgmr.msra.gmra.mxu0 %vm52_vm1, %v50_v3  ;;  %238 = vmatmul.mubr.msk.f32.vlgmr.msra.gmra.mxu1 %vm52_vm1, %v50_v3  ;;  %p313_p4 = por %p312_p3, %p311_p2 }
  0x2d   :  { %p314_p5 = pnand %p313_p4, %p307_p1 }
  0xeb   :  { %v125_v4 = vpop.f32.mrf.mxu0  ;;  %v201_v5 = vpop.f32.mrf.mxu1 }
  0xec   :  { %130 = vst.msk [vmem:[#allocation8] sm:$0x1] %vm129_vm2, %v125_v4  ;;  %205 = vst.msk [vmem:[#allocation8 + $0x1] sm:$0x1] %vm129_vm2, %v201_v5 }
  0xed   :  { %v234_v6 = vpop.f32.mrf.mxu0  ;;  %v239_v7 = vpop.f32.mrf.mxu1 }
  0xee   :  { %317 = shalt.err (!%p314_p5)
}
  0xef   :  { %215 = dma.vmem_to_hbm [thread:$0]  %s213_s2, 32, %s373_s3, [#allocation4]  }
  0xf0   :  { %330 = dma.done.wait [#allocation4], 32  }
  0xf1   :  { %331 = vsyncadd [#allocation4], 4294967264 }
  0xf2   :  { %219 = vsyncpa [#allocation3], 1 }
  0xf3   :  { %220 = vsyncpa [#allocation6], 1 }
  0xf4   :  { %221 = vsyncpa [#allocation4], 1 }

</bundles_post_ra>
